<compile_context>
chip_gen: v5e
topology: v5e:2x2
jax: 0.10.0
libtpu: 0.0.40
codegen_flags: <defaults>
</compile_context>

<pallas_src>
import functools

import jax
import jax.numpy as jnp
from jax.experimental import pallas as pl
from jax.experimental.pallas import tpu as pltpu


def _conv_ffn_kernel(xp_ref, x_ref, w1_ref, b1_ref, w2_ref, b2_ref,
                     g_ref, beta_ref, o_ref, *, T, K, pad, eps):
    # xp_ref : (Bblk, T + 2*pad, d_in)  bf16  zero time-padded input
    # x_ref  : (Bblk, T, d_in)          f32   residual input
    # w1_ref : (K*d_in, d_hid)          bf16  conv1 weights, tap-major rows
    # w2_ref : (K*d_hid, d_in)          bf16  conv2 weights, tap-major rows
    # b1/b2/g/beta refs : (1, d)        f32
    # o_ref  : (Bblk, T, d_in)
    Bblk, _, d_in = x_ref.shape
    d_hid = w1_ref.shape[1]

    # ---- conv1: im2col (K shifted time slices concatenated on the channel axis)
    #      -> one (Bblk*T, K*d_in) @ (K*d_in, d_hid) MXU matmul, f32 accumulation.
    xp = xp_ref[...]
    xu = jnp.concatenate([xp[:, j:j + T, :] for j in range(K)], axis=-1)
    xu = xu.reshape(Bblk * T, K * d_in)
    h = jnp.dot(xu, w1_ref[...], preferred_element_type=jnp.float32)
    h = jnp.maximum(h + b1_ref[...], 0.0)                     # (Bblk*T, d_hid) f32

    # ---- conv2: in-register zero time-pad of the hidden activations
    #      (no VMEM scratch round trip), im2col again, one MXU matmul.
    hb = h.astype(jnp.bfloat16).reshape(Bblk, T, d_hid)
    zpad = jnp.zeros((Bblk, pad, d_hid), jnp.bfloat16)
    hp = jnp.concatenate([zpad, hb, zpad], axis=1)            # (Bblk, T+2*pad, d_hid)
    hu = jnp.concatenate([hp[:, j:j + T, :] for j in range(K)], axis=-1)
    hu = hu.reshape(Bblk * T, K * d_hid)
    out = jnp.dot(hu, w2_ref[...], preferred_element_type=jnp.float32) + b2_ref[...]

    # ---- dropout (eval: identity) + residual + LayerNorm over last dim (f32).
    y = out + x_ref[...].reshape(Bblk * T, d_in)
    mean = jnp.mean(y, axis=-1, keepdims=True)
    var = jnp.mean((y - mean) ** 2, axis=-1, keepdims=True)
    yn = (y - mean) * jax.lax.rsqrt(var + eps)
    res = yn * g_ref[...] + beta_ref[...]
    o_ref[...] = res.reshape(Bblk, T, d_in).astype(o_ref.dtype)


def _pick_batch_block(B, max_block=8):
    """Largest divisor of B <= max_block that still leaves >= 2 grid steps
    (v7x has 2 TensorCores; with a single grid step one core idles)."""
    best = 1
    for c in range(1, min(B, max_block) + 1):
        if B % c == 0 and (B == 1 or B // c >= 2):
            best = c
    return best


def conv1d_layer_forward(x, w1, b1, w2, b2, gamma, beta, *, kernel_size, eps=1e-5,
                         max_batch_block=8):
    """x: (B, T, d_in) f32.  w1: (K, d_in, d_hid), w2: (K, d_hid, d_in) (tap-major)."""
    B, T, d_in = x.shape
    K = kernel_size
    # NOTE: padding (K-1)//2 matches the PyTorch Conv1d output length only for odd K
    # (which is what the module's config uses).
    assert K % 2 == 1, "kernel_size must be odd to match the PyTorch module"
    pad = (K - 1) // 2
    d_hid = w1.shape[2]
    Tp = T + 2 * pad

    bblk = _pick_batch_block(B, max_batch_block)
    grid_b = B // bblk

    # bf16 MXU operands (f32 accumulation in-kernel); residual/LN path stays f32.
    x_pad = jnp.pad(x, ((0, 0), (pad, pad), (0, 0))).astype(jnp.bfloat16)
    # Tap-major layout makes the im2col weight flatten a pure reshape:
    # row (j*d_in + ci) of w1f multiplies x[t + j - pad, ci].
    w1f = w1.reshape(K * d_in, d_hid).astype(jnp.bfloat16)
    w2f = w2.reshape(K * d_hid, d_in).astype(jnp.bfloat16)
    b1_2d = b1.reshape(1, d_hid).astype(jnp.float32)
    b2_2d = b2.reshape(1, d_in).astype(jnp.float32)
    g_2d = gamma.reshape(1, d_in).astype(jnp.float32)
    beta_2d = beta.reshape(1, d_in).astype(jnp.float32)

    kernel = functools.partial(_conv_ffn_kernel, T=T, K=K, pad=pad, eps=eps)

    return pl.pallas_call(
        kernel,
        out_shape=jax.ShapeDtypeStruct((B, T, d_in), x.dtype),
        grid_spec=pltpu.PrefetchScalarGridSpec(
            num_scalar_prefetch=0,
            grid=(grid_b,),
            in_specs=[
                pl.BlockSpec((bblk, Tp, d_in), lambda b: (b, 0, 0)),     # padded input (bf16)
                pl.BlockSpec((bblk, T, d_in), lambda b: (b, 0, 0)),      # residual (f32)
                pl.BlockSpec((K * d_in, d_hid), lambda b: (0, 0)),       # w1 (im2col-flattened)
                pl.BlockSpec((1, d_hid), lambda b: (0, 0)),              # b1
                pl.BlockSpec((K * d_hid, d_in), lambda b: (0, 0)),       # w2 (im2col-flattened)
                pl.BlockSpec((1, d_in), lambda b: (0, 0)),               # b2
                pl.BlockSpec((1, d_in), lambda b: (0, 0)),               # gamma
                pl.BlockSpec((1, d_in), lambda b: (0, 0)),               # beta
            ],
            out_specs=pl.BlockSpec((bblk, T, d_in), lambda b: (b, 0, 0)),
        ),
        compiler_params=pltpu.CompilerParams(
            dimension_semantics=("parallel",)),
    )(x_pad, x, w1f, b1_2d, w2f, b2_2d, g_2d, beta_2d)


def reference_forward(x, w1, b1, w2, b2, gamma, beta, *, kernel_size, eps=1e-5):
    """Pure-JAX f32 reference mirroring the PyTorch forward (eval mode)."""
    pad = (kernel_size - 1) // 2
    T = x.shape[1]
    xp = jnp.pad(x, ((0, 0), (pad, pad), (0, 0)))
    h = sum(jnp.einsum('btd,df->btf', xp[:, j:j + T, :], w1[j])
            for j in range(kernel_size)) + b1
    h = jnp.maximum(h, 0.0)
    hp = jnp.pad(h, ((0, 0), (pad, pad), (0, 0)))
    o = sum(jnp.einsum('btf,fd->btd', hp[:, j:j + T, :], w2[j])
            for j in range(kernel_size)) + b2
    y = o + x
    mean = jnp.mean(y, -1, keepdims=True)
    var = jnp.mean((y - mean) ** 2, -1, keepdims=True)
    return (y - mean) * jax.lax.rsqrt(var + eps) * gamma + beta


def reference_forward_bf16(x, w1, b1, w2, b2, gamma, beta, *, kernel_size, eps=1e-5):
    """Reference that mirrors the kernel's numerics (bf16 MXU operands, f32 accum)."""
    pad = (kernel_size - 1) // 2
    T = x.shape[1]
    xp = jnp.pad(x, ((0, 0), (pad, pad), (0, 0))).astype(jnp.bfloat16)
    w1b = w1.astype(jnp.bfloat16)
    w2b = w2.astype(jnp.bfloat16)
    h = sum(jnp.einsum('btd,df->btf', xp[:, j:j + T, :], w1b[j],
                       preferred_element_type=jnp.float32)
            for j in range(kernel_size)) + b1
    h = jnp.maximum(h, 0.0).astype(jnp.bfloat16)
    hp = jnp.pad(h, ((0, 0), (pad, pad), (0, 0)))
    o = sum(jnp.einsum('btf,fd->btd', hp[:, j:j + T, :], w2b[j],
                       preferred_element_type=jnp.float32)
            for j in range(kernel_size)) + b2
    y = o + x
    mean = jnp.mean(y, -1, keepdims=True)
    var = jnp.mean((y - mean) ** 2, -1, keepdims=True)
    return (y - mean) * jax.lax.rsqrt(var + eps) * gamma + beta


if __name__ == "__main__":
    # config: hidden_dim=32, filter_num=64, kernel_size=3, dropout=0.1 (eval -> identity)
    B, T, d_in, d_hid, K = 2, 16, 32, 64, 3

    key = jax.random.PRNGKey(0)
    kx, kw1, kb1, kw2, kb2 = jax.random.split(key, 5)

    x = jax.random.normal(kx, (B, T, d_in), jnp.float32)
    # Tap-major weights: w1[j, ci, co] == torch_w1[co, ci, j]
    w1 = jax.random.normal(kw1, (K, d_in, d_hid), jnp.float32) * 0.1
    b1 = jax.random.normal(kb1, (d_hid,), jnp.float32) * 0.1
    w2 = jax.random.normal(kw2, (K, d_hid, d_in), jnp.float32) * 0.1
    b2 = jax.random.normal(kb2, (d_in,), jnp.float32) * 0.1
    gamma = jnp.ones((d_in,), jnp.float32)
    beta = jnp.zeros((d_in,), jnp.float32)

    out = conv1d_layer_forward(x, w1, b1, w2, b2, gamma, beta, kernel_size=K)
    out = jax.block_until_ready(out)
    assert out.shape == (B, T, d_in)

    # Tight check against a reference that mirrors the kernel's bf16 matmul operands.
    ref16 = reference_forward_bf16(x, w1, b1, w2, b2, gamma, beta, kernel_size=K)
    assert jnp.allclose(out, ref16, atol=2e-3, rtol=2e-3), "mismatch vs bf16 reference"

    # Loose sanity check against the pure-f32 PyTorch-equivalent reference.
    ref32 = reference_forward(x, w1, b1, w2, b2, gamma, beta, kernel_size=K)
    assert jnp.allclose(out, ref32, atol=1e-1, rtol=1e-1), "mismatch vs f32 reference"

    print("KERNEL_OK")
</pallas_src>

<mosaic_0001>
module attributes {stable_mosaic.version = 11 : i64} {
  func.func @_conv_ffn_kernel(%arg0: i32, %arg1: memref<1x18x32xbf16, #tpu.memory_space<vmem>>, %arg2: memref<1x16x32xf32, #tpu.memory_space<vmem>>, %arg3: memref<96x64xbf16, #tpu.memory_space<vmem>>, %arg4: memref<1x64xf32, #tpu.memory_space<vmem>>, %arg5: memref<192x32xbf16, #tpu.memory_space<vmem>>, %arg6: memref<1x32xf32, #tpu.memory_space<vmem>>, %arg7: memref<1x32xf32, #tpu.memory_space<vmem>>, %arg8: memref<1x32xf32, #tpu.memory_space<vmem>>, %arg9: memref<1x16x32xf32, #tpu.memory_space<vmem>>) attributes {dimension_semantics = [#tpu.dimension_semantics<parallel>], iteration_bounds = array<i64: 2>, scalar_prefetch = 0 : i64, scratch_operands = 0 : i64, tpu.core_type = #tpu.core_type<tc>, window_params = [{transform_indices = @transform_0, window_bounds = array<i64: 1, 18, 32>}, {transform_indices = @transform_1, window_bounds = array<i64: 1, 16, 32>}, {pipeline_mode = #tpu.pipeline_mode<synchronous>, transform_indices = @transform_2, window_bounds = array<i64: 96, 64>}, {pipeline_mode = #tpu.pipeline_mode<synchronous>, transform_indices = @transform_3, window_bounds = array<i64: 1, 64>}, {pipeline_mode = #tpu.pipeline_mode<synchronous>, transform_indices = @transform_4, window_bounds = array<i64: 192, 32>}, {pipeline_mode = #tpu.pipeline_mode<synchronous>, transform_indices = @transform_5, window_bounds = array<i64: 1, 32>}, {pipeline_mode = #tpu.pipeline_mode<synchronous>, transform_indices = @transform_6, window_bounds = array<i64: 1, 32>}, {pipeline_mode = #tpu.pipeline_mode<synchronous>, transform_indices = @transform_7, window_bounds = array<i64: 1, 32>}, {transform_indices = @transform_8, window_bounds = array<i64: 1, 16, 32>}]} {
    %c0 = arith.constant 0 : index
    %c0_0 = arith.constant 0 : index
    %c0_1 = arith.constant 0 : index
    %0 = vector.load %arg1[%c0, %c0_0, %c0_1] : memref<1x18x32xbf16, #tpu.memory_space<vmem>>, vector<1x18x32xbf16>
    %1 = vector.extract_strided_slice %0 {offsets = [0, 0, 0], sizes = [1, 16, 32], strides = [1, 1, 1]} : vector<1x18x32xbf16> to vector<1x16x32xbf16>
    %2 = vector.extract_strided_slice %0 {offsets = [0, 1, 0], sizes = [1, 16, 32], strides = [1, 1, 1]} : vector<1x18x32xbf16> to vector<1x16x32xbf16>
    %3 = vector.extract_strided_slice %0 {offsets = [0, 2, 0], sizes = [1, 16, 32], strides = [1, 1, 1]} : vector<1x18x32xbf16> to vector<1x16x32xbf16>
    %4 = tpu.concatenate %1, %2, %3 in 2 : vector<1x16x32xbf16>, vector<1x16x32xbf16>, vector<1x16x32xbf16> -> vector<1x16x96xbf16>
    %5 = vector.shape_cast %4 : vector<1x16x96xbf16> to vector<16x96xbf16>
    %c0_2 = arith.constant 0 : index
    %c0_3 = arith.constant 0 : index
    %6 = vector.load %arg3[%c0_2, %c0_3] : memref<96x64xbf16, #tpu.memory_space<vmem>>, vector<96x64xbf16>
    %cst = arith.constant dense<0.000000e+00> : vector<16x64xf32>
    %7 = tpu.matmul %5, %6, %cst {dimension_numbers = #tpu.dot_dimension_numbers<[1], [0], [0], [1], [0, 0, 1, 1], [], []>} : vector<16x96xbf16>, vector<96x64xbf16>, vector<16x64xf32> -> vector<16x64xf32>
    %c0_4 = arith.constant 0 : index
    %c0_5 = arith.constant 0 : index
    %8 = vector.load %arg4[%c0_4, %c0_5] : memref<1x64xf32, #tpu.memory_space<vmem>>, vector<1x64xf32>
    %9 = vector.broadcast %8 : vector<1x64xf32> to vector<16x64xf32>
    %10 = arith.addf %7, %9 : vector<16x64xf32>
    %cst_6 = arith.constant 0.000000e+00 : f32
    %11 = vector.broadcast %cst_6 : f32 to vector<16x64xf32>
    %12 = arith.maximumf %10, %11 : vector<16x64xf32>
    %13 = arith.truncf %12 : vector<16x64xf32> to vector<16x64xbf16>
    %14 = vector.shape_cast %13 : vector<16x64xbf16> to vector<1x16x64xbf16>
    %cst_7 = arith.constant 0.000000e+00 : bf16
    %15 = vector.broadcast %cst_7 : bf16 to vector<1x1x64xbf16>
    %16 = tpu.concatenate %15, %14, %15 in 1 : vector<1x1x64xbf16>, vector<1x16x64xbf16>, vector<1x1x64xbf16> -> vector<1x18x64xbf16>
    %17 = vector.extract_strided_slice %16 {offsets = [0, 0, 0], sizes = [1, 16, 64], strides = [1, 1, 1]} : vector<1x18x64xbf16> to vector<1x16x64xbf16>
    %18 = vector.extract_strided_slice %16 {offsets = [0, 1, 0], sizes = [1, 16, 64], strides = [1, 1, 1]} : vector<1x18x64xbf16> to vector<1x16x64xbf16>
    %19 = vector.extract_strided_slice %16 {offsets = [0, 2, 0], sizes = [1, 16, 64], strides = [1, 1, 1]} : vector<1x18x64xbf16> to vector<1x16x64xbf16>
    %20 = tpu.concatenate %17, %18, %19 in 2 : vector<1x16x64xbf16>, vector<1x16x64xbf16>, vector<1x16x64xbf16> -> vector<1x16x192xbf16>
    %21 = vector.shape_cast %20 : vector<1x16x192xbf16> to vector<16x192xbf16>
    %c0_8 = arith.constant 0 : index
    %c0_9 = arith.constant 0 : index
    %22 = vector.load %arg5[%c0_8, %c0_9] : memref<192x32xbf16, #tpu.memory_space<vmem>>, vector<192x32xbf16>
    %cst_10 = arith.constant dense<0.000000e+00> : vector<16x32xf32>
    %23 = tpu.matmul %21, %22, %cst_10 {dimension_numbers = #tpu.dot_dimension_numbers<[1], [0], [0], [1], [0, 0, 1, 1], [], []>} : vector<16x192xbf16>, vector<192x32xbf16>, vector<16x32xf32> -> vector<16x32xf32>
    %c0_11 = arith.constant 0 : index
    %c0_12 = arith.constant 0 : index
    %24 = vector.load %arg6[%c0_11, %c0_12] : memref<1x32xf32, #tpu.memory_space<vmem>>, vector<1x32xf32>
    %25 = vector.broadcast %24 : vector<1x32xf32> to vector<16x32xf32>
    %26 = arith.addf %23, %25 : vector<16x32xf32>
    %c0_13 = arith.constant 0 : index
    %c0_14 = arith.constant 0 : index
    %c0_15 = arith.constant 0 : index
    %27 = vector.load %arg2[%c0_13, %c0_14, %c0_15] : memref<1x16x32xf32, #tpu.memory_space<vmem>>, vector<1x16x32xf32>
    %28 = vector.shape_cast %27 : vector<1x16x32xf32> to vector<16x32xf32>
    %29 = arith.addf %26, %28 : vector<16x32xf32>
    %cst_16 = arith.constant dense<0.000000e+00> : vector<16xf32>
    %30 = vector.multi_reduction <add>, %29, %cst_16 [1] : vector<16x32xf32> to vector<16xf32>
    %31 = vector.shape_cast %30 : vector<16xf32> to vector<16x1xf32>
    %cst_17 = arith.constant 3.200000e+01 : f32
    %32 = vector.broadcast %cst_17 : f32 to vector<16x1xf32>
    %33 = arith.divf %31, %32 : vector<16x1xf32>
    %34 = vector.broadcast %33 : vector<16x1xf32> to vector<16x32xf32>
    %35 = arith.subf %29, %34 : vector<16x32xf32>
    %36 = arith.mulf %35, %35 : vector<16x32xf32>
    %cst_18 = arith.constant dense<0.000000e+00> : vector<16xf32>
    %37 = vector.multi_reduction <add>, %36, %cst_18 [1] : vector<16x32xf32> to vector<16xf32>
    %38 = vector.shape_cast %37 : vector<16xf32> to vector<16x1xf32>
    %cst_19 = arith.constant 3.200000e+01 : f32
    %39 = vector.broadcast %cst_19 : f32 to vector<16x1xf32>
    %40 = arith.divf %38, %39 : vector<16x1xf32>
    %41 = vector.broadcast %33 : vector<16x1xf32> to vector<16x32xf32>
    %42 = arith.subf %29, %41 : vector<16x32xf32>
    %cst_20 = arith.constant 9.99999974E-6 : f32
    %43 = vector.broadcast %cst_20 : f32 to vector<16x1xf32>
    %44 = arith.addf %40, %43 : vector<16x1xf32>
    %45 = math.rsqrt %44 : vector<16x1xf32>
    %46 = vector.broadcast %45 : vector<16x1xf32> to vector<16x32xf32>
    %47 = arith.mulf %42, %46 : vector<16x32xf32>
    %c0_21 = arith.constant 0 : index
    %c0_22 = arith.constant 0 : index
    %48 = vector.load %arg7[%c0_21, %c0_22] : memref<1x32xf32, #tpu.memory_space<vmem>>, vector<1x32xf32>
    %49 = vector.broadcast %48 : vector<1x32xf32> to vector<16x32xf32>
    %50 = arith.mulf %47, %49 : vector<16x32xf32>
    %c0_23 = arith.constant 0 : index
    %c0_24 = arith.constant 0 : index
    %51 = vector.load %arg8[%c0_23, %c0_24] : memref<1x32xf32, #tpu.memory_space<vmem>>, vector<1x32xf32>
    %52 = vector.broadcast %51 : vector<1x32xf32> to vector<16x32xf32>
    %53 = arith.addf %50, %52 : vector<16x32xf32>
    %54 = vector.shape_cast %53 : vector<16x32xf32> to vector<1x16x32xf32>
    %c0_25 = arith.constant 0 : index
    %c0_26 = arith.constant 0 : index
    %c0_27 = arith.constant 0 : index
    %55 = vector.load %arg9[%c0_25, %c0_26, %c0_27] : memref<1x16x32xf32, #tpu.memory_space<vmem>>, vector<1x16x32xf32>
    tpu.vector_store %arg9[%c0_25, %c0_26, %c0_27], %54 {strides = array<i32>} : memref<1x16x32xf32, #tpu.memory_space<vmem>>, vector<1x16x32xf32>,
    return
  }
  func.func @transform_0(%arg0: i32) -> (i32, i32, i32) {
    %c0_i32 = arith.constant 0 : i32
    %c0_i32_0 = arith.constant 0 : i32
    %c0_i32_1 = arith.constant 0 : i32
    return %arg0, %c0_i32, %c0_i32_0 : i32, i32, i32
  }
  func.func @transform_1(%arg0: i32) -> (i32, i32, i32) {
    %c0_i32 = arith.constant 0 : i32
    %c0_i32_0 = arith.constant 0 : i32
    %c0_i32_1 = arith.constant 0 : i32
    return %arg0, %c0_i32, %c0_i32_0 : i32, i32, i32
  }
  func.func @transform_2(%arg0: i32) -> (i32, i32) {
    %c0_i32 = arith.constant 0 : i32
    %c0_i32_0 = arith.constant 0 : i32
    %c0_i32_1 = arith.constant 0 : i32
    return %c0_i32, %c0_i32_0 : i32, i32
  }
  func.func @transform_3(%arg0: i32) -> (i32, i32) {
    %c0_i32 = arith.constant 0 : i32
    %c0_i32_0 = arith.constant 0 : i32
    %c0_i32_1 = arith.constant 0 : i32
    return %c0_i32, %c0_i32_0 : i32, i32
  }
  func.func @transform_4(%arg0: i32) -> (i32, i32) {
    %c0_i32 = arith.constant 0 : i32
    %c0_i32_0 = arith.constant 0 : i32
    %c0_i32_1 = arith.constant 0 : i32
    return %c0_i32, %c0_i32_0 : i32, i32
  }
  func.func @transform_5(%arg0: i32) -> (i32, i32) {
    %c0_i32 = arith.constant 0 : i32
    %c0_i32_0 = arith.constant 0 : i32
    %c0_i32_1 = arith.constant 0 : i32
    return %c0_i32, %c0_i32_0 : i32, i32
  }
  func.func @transform_6(%arg0: i32) -> (i32, i32) {
    %c0_i32 = arith.constant 0 : i32
    %c0_i32_0 = arith.constant 0 : i32
    %c0_i32_1 = arith.constant 0 : i32
    return %c0_i32, %c0_i32_0 : i32, i32
  }
  func.func @transform_7(%arg0: i32) -> (i32, i32) {
    %c0_i32 = arith.constant 0 : i32
    %c0_i32_0 = arith.constant 0 : i32
    %c0_i32_1 = arith.constant 0 : i32
    return %c0_i32, %c0_i32_0 : i32, i32
  }
  func.func @transform_8(%arg0: i32) -> (i32, i32, i32) {
    %c0_i32 = arith.constant 0 : i32
    %c0_i32_0 = arith.constant 0 : i32
    %c0_i32_1 = arith.constant 0 : i32
    return %arg0, %c0_i32, %c0_i32_0 : i32, i32, i32
  }
}

</mosaic_0001>

<bundles_post_ra>
// kernel: tpu_custom_call.1
= control target key start
LH: loop header
LB: loop body
LE: loop exit
PB: predicated region body
PF: predicated region fallthrough
CT: control target
= control target key end

     0   :  { %13 = vsyncpa [#allocation3], 0  ;;  %s1222_s0 = inlined_call_operand.vmem [shape: bf16[2,18,32], index: 0, kind: input, shape index: {}]   ;;  %s1223_s1 = inlined_call_operand.vmem [shape: f32[2,16,32], index: 1, kind: input, shape index: {}]   ;;  %s1224_s2 = inlined_call_operand.vmem [shape: bf16[96,64], index: 2, kind: input, shape index: {}]   ;;  %s1225_s3 = inlined_call_operand.vmem [shape: f32[1,64], index: 3, kind: input, shape index: {}]   ;;  %s1226_s4 = inlined_call_operand.vmem [shape: bf16[192,32], index: 4, kind: input, shape index: {}]   ;;  %s1227_s5 = inlined_call_operand.vmem [shape: f32[1,32], index: 5, kind: input, shape index: {}]   ;;  %s1228_s6 = inlined_call_operand.vmem [shape: f32[1,32], index: 6, kind: input, shape index: {}]   ;;  %s1229_s7 = inlined_call_operand.vmem [shape: f32[1,32], index: 7, kind: input, shape index: {}]   ;;  %s1230_s8 = inlined_call_operand.hbm [shape: f32[2,16,32], index: 8, kind: output, shape index: {}]  }
   0x1   :  { %15 = vsyncpa [#allocation3 + $0x1], 0  ;;  %s1048_s27 = smov 0   ;;  %s1050_s28 = smov 0  }
   0x2   :  { %s1052_s29 = smov 0   ;;  %s1054_s30 = smov 0  }
   0x3 LB: > { %s1069_s9 = sadd.s32 4294967295, %s996_s30   ;;  %s767_s10 = sadd.s32 4294967294, %s996_s30   ;;  %s996_s30 = sphi %s1054_s30, %s1236_s30   ;;  %s992_s29 = sphi %s1052_s29, %s1235_s29   ;;  %s988_s28 = sphi %s1050_s28, %s1234_s28   ;;  %s984_s27 = sphi %s1048_s27, %s1233_s27  }
   0x4   : > { %s1073_s11 = sadd.s32 1, %s996_s30   ;;  %s206_s12 = sadd.s32 1, %s992_s29 }
   0x5   : > { %s203_s13 = ssub.s32 %s996_s30, %s1073_s11  ;;  %p216_p0 = scmp.ne.s32.totalorder %s992_s29, %s988_s28 }
   0x6   : > { %p204_p1 = scmp.eq.s32.totalorder %s203_s13, 0  ;;  %p217_p2 = scmp.eq.s32.totalorder %s1069_s9, 1 }
   0x7   : > { %p222_p3 = scmp.ne.s32.totalorder %s988_s28, %s984_s27  ;;  %p223_p4 = scmp.eq.s32.totalorder %s767_s10, 1 }
   0x8   : > { %s1084_s14 = scalar_select %p204_p1, %s992_s29, %s206_s12  }
   0x9   : > { %p1086_p5 = por %p217_p2, %p216_p0  ;;  %p1090_p6 = por %p223_p4, %p222_p3 }
   0xa   : > { %p770_p7 = scmp.ge.s32.totalorder %s996_s30, 1  ;;  %p275_p8 = scmp.lt.s32.totalorder %s996_s30, 3 }
   0xc   : > { %p276_p9 = pnand %p770_p7, %p275_p8 }
   0xd   : > { %p314_p10 = scmp.lt.s32.totalorder (!%p276_p9), %s1069_s9, 1  ;;  %s998_s17 = smov (!%p276_p9), 32  }
   0xe   : > { %279 = sbr.rel (%p276_p9) target bundleno = 844 (0x34c), region = 52  ;;  %s999_s18 = smov (!%p276_p9), 64  }
   0xf   : > { %s878_s10 = sshll.u32 (!%p276_p9), %s1069_s9, 4 }
  0x13   : > { %v865_v0 = vld [vmem:[%s1224_s2 + $0x28] sm:$0xff]  ;;  %s1101_s19 = scalar_select %p314_p10, %s1069_s9, 1  ;;  %v864_v1 = vld [vmem:[%s1224_s2 + $0x20] sm:$0xff]  ;;  %v863_v2 = vld [vmem:[%s1224_s2 + $0x18] sm:$0xff]  ;;  %vm336_vm0 = vsmask.f32 7424 }
  0x14   : > { %420 = vmatpush.bf16.msra.mxu0 %v865_v0  ;;  %v862_v9 = vld [vmem:[%s1224_s2 + $0x10] sm:$0xff]  ;;  %vm351_vm1 = vcmask 1046528   ;;  %v861_v18 = vld [vmem:[%s1224_s2 + $0x8] sm:$0xff]  ;;  %v860_v19 = vld [vmem:[%s1224_s2] sm:$0xff]  ;;  %vm357_vm2 = vcmask 261120   ;;  %vm360_vm3 = vcmask 523264  }
  0x15   : > { %s879_s22 = smul.u32 12, %s1101_s19  ;;  %vm415_vm4 = vcmask 785408   ;;  %v877_v24 = vld [vmem:[%s1226_s4 + $0x58] sm:$0xff]  ;;  %v876_v25 = vld [vmem:[%s1226_s4 + $0x50] sm:$0xff]  ;;  %v875_v26 = vld [vmem:[%s1226_s4 + $0x48] sm:$0xff]  ;;  %vm450_vm5 = vcmask 1040384  }
  0x16   : > { %598 = vmatpush.bf16.msra.mxu2 %v877_v24  ;;  %v874_v27 = vld [vmem:[%s1226_s4 + $0x40] sm:$0xff]  ;;  %v873_v30 = vld [vmem:[%s1226_s4 + $0x38] sm:$0xff]  ;;  %v872_v32 = vld [vmem:[%s1226_s4 + $0x30] sm:$0xff]  ;;  %vm451_vm6 = vsmask.f32 256  ;;  %s858_s12 = sshll.u32 %s1101_s19, 4 }
  0x17   : > { %s318_s25 = scalar_lea.vmem %s1222_s0, %s879_s22  ;;  %v924_v28 = vld [vmem:[%s1225_s3] ss:$0 sm:$0xff]  ;;  %580 = vmatpush.bf16.msra.mxu1 %v873_v30  ;;  %v871_v34 = vld [vmem:[%s1226_s4 + $0x28] sm:$0xff]  ;;  %v869_v43 = vld [vmem:[%s1226_s4 + $0x18] sm:$0xff]  ;;  %s323_s22 = scalar_lea.vmem %s1223_s1, %s858_s12 }
  0x18   : > { %421 = vmatpush.bf16.msra.mxu0 %v864_v1  ;;  %v859_v3 = vld [vmem:[%s318_s25] sm:$0xff]  ;;  %v327_v4 = vld [vmem:[%s318_s25 + $0x8] sm:$0x1]  ;;  %v868_v46 = vld [vmem:[%s1226_s4 + $0x10] sm:$0xff]  ;;  %s311_s19 = sand.u32 1, %s988_s28  }
  0x19   : > { %v334_v5 = vunpack.c.l.b16 %v327_v4  ;;  %v338_v6 = vshrl.u32 %v859_v3, 16  ;;  %v340_v7 = vshll.u32 %v859_v3, 16  ;;  %v352_v15 = vrot.slane %v859_v3, 1  ;;  %v870_v39 = vld [vmem:[%s1226_s4 + $0x20] sm:$0xff]  ;;  %vm452_vm7 = vmand %vm450_vm5, %vm451_vm6  ;;  %v867_v51 = vld [vmem:[%s1226_s4 + $0x8] sm:$0xff]  ;;  %s771_s26 = sshll.u32 %s311_s19, 4 }
  0x1a   : > { %599 = vmatpush.bf16.msra.mxu2 %v876_v25  ;;  %v866_v57 = vld [vmem:[%s1226_s4] sm:$0xff]  ;;  %s313_s20 = scalar_lea.vmem [#allocation2], %s771_s26  ;;  %s678_s9 = scalar_lea.sflag [#allocation3], %s311_s19 }
  0x1b   : > { %v335_v8 = vpack.c.b16 %v334_v5, %v334_v5  ;;  %v342_v10 = vrot.slane %v340_v7, 1  ;;  %581 = vmatpush.bf16.msra.mxu1 %v872_v32  ;;  %s690_s21 = sshll.u32 %s313_s20, 4  ;;  %s954_s26 = scalar_lea.hbm %s1230_s8, 32  ;;  %s691_s21 = int_to_ptr.vmem [resolvable:$true] %s690_s21 }
  0x1c   : > { %422 = vmatpush.bf16.msra.mxu0 %v863_v2  ;;  %v925_v2 = vld [vmem:[%s1227_s5] ss:$0 sm:$0xff] }
  0x1d   : > { %v345_v11 = vshll.u32 %v335_v8, 16  ;;  %v343_v12 = vor.u32 %v342_v10, %v338_v6  ;;  %v353_v16 = vrot.slane %v335_v8, 1  ;;  %v608_v6 = vld [vmem:[%s323_s22] sm:$0xff] }
  0x1e   : > { %600 = vmatpush.bf16.msra.mxu2 %v875_v26 }
  0x1f   : > { %v347_v13 = vrot.slane %v345_v11, 1  ;;  %v354_v17 = vsel %vm351_vm1, %v352_v15, %v353_v16  ;;  %582 = vmatpush.bf16.msra.mxu1 %v871_v34 }
  0x20   : > { %423 = vmatpush.bf16.msra.mxu0 %v862_v9 }
  0x21   : > { %v348_v14 = vsel %vm336_vm0, %v343_v12, %v347_v13  ;;  %v609_v13 = vld [vmem:[%s323_s22 + $0x8] sm:$0xff] }
  0x22   : > { %349 = vrot.lane.b32.xlu0 %v348_v14, %s998_s17  ;;  %601 = vmatpush.bf16.msra.mxu2 %v874_v27  ;;  %s689_s17 = scalar_lea.hbm %s1230_s8, %s878_s10 }
  0x23   : > { %583 = vmatpush.bf16.msra.mxu1 %v870_v39  ;;  %s692_s22 = sshll.u32 %s689_s17, 4  ;;  %s693_s22 = int_to_ptr.hbm [resolvable:$true] %s692_s22 }
  0x24   : > { %424 = vmatpush.bf16.msra.mxu0 %v861_v18 }
  0x27   : > { %584 = vmatpush.bf16.msra.mxu1 %v869_v43 }
  0x28   : > { %425 = vmatpush.bf16.msra.mxu0 %v860_v19 }
  0x2a   : > { %355 = vrot.lane.b32.xlu0 %v354_v17, %s999_s18  ;;  %v1000_v17 = vmov 32.0  }
  0x2b   : > { %585 = vmatpush.bf16.msra.mxu1 %v868_v46  ;;  %928 = vrcp.f32 %v1000_v17 }
  0x2f   : > { %586 = vmatpush.bf16.msra.mxu1 %v867_v51  ;;  %v927_v51 = vld [vmem:[%s1229_s7] ss:$0 sm:$0xff] }
  0x31   : > { %v929_v18 = vpop.eup %928 }
  0x32   : > { %v619_v19 = vmul.f32 32.0, %v929_v18  ;;  %vm623_vm8 = vweird.f32 %v929_v18 }
  0x33   : > { %587 = vmatpush.bf16.msra.mxu1 %v866_v57 }
  0x94   : > { %v350_v20 = vpop.permute.xlu0 %349 }
  0x95   : > { %v359_v21 = vsel %vm357_vm2, %v859_v3, %v350_v20  ;;  %v620_v20 = vsub.f32 1.0, %v619_v19 }
  0x9c   : > { %v356_v22 = vpop.permute.xlu0 %355 }
  0x9d   : > { %v362_v23 = vsel %vm360_vm3, %v359_v21, %v356_v22  ;;  %v621_v21 = vmul.f32 %v929_v18, %v620_v20 }
  0x9e   : > { %803 = vmatmul.msk.bf16.vlgmr.msra.gmra.mxu0 %vm415_vm4, %v362_v23 }
  0x9f   : > { %v622_v22 = vadd.f32 %v929_v18, %v621_v21 }
  0xa1   : > { %v624_v23 = vsel %vm623_vm8, %v929_v18, %v622_v22 }
 0x11b   : > { %v427_v29 = vpop.f32.mrf.mxu0 }
 0x11c   : > { %v428_v31 = vadd.f32 %v924_v28, %v427_v29 }
 0x11e   : > { %v432_v33 = vmax.f32 %v428_v31, 0.0 }
 0x120   : > { %v434_v37 = vpack.c.bf16 %v432_v33, %v432_v33 }
 0x122   : > { %v438_v41 = vunpack.c.l.b16 %v434_v37 }
 0x123   : > { %v429_v35 = vpop.f32.mrf.mxu0 }
 0x124   : > { %v430_v36 = vadd.f32 %v924_v28, %v429_v35 }
 0x126   : > { %v433_v38 = vmax.f32 %v430_v36, 0.0 }
 0x128   : > { %v435_v40 = vpack.c.bf16 %v433_v38, %v433_v38 }
 0x12a   : > { %v439_v42 = vunpack.c.l.b16 %v435_v40 }
 0x12c   : > { %v440_v44 = vpack.c.b16 %v439_v42, %v438_v41 }
 0x12e   : > { %v442_v45 = vshrl.u32 %v440_v44, 16  ;;  %v445_v48 = vshll.u32 %v440_v44, 16 }
 0x130   : > { %v444_v47 = vrot.slane %v442_v45, 7 }
 0x132   : > { %v447_v49 = vor.u32 %v445_v48, %v444_v47  ;;  %v454_v50 = vsel %vm452_vm7, %v444_v47, 0  ;;  %v926_v48 = vld [vmem:[%s1228_s6] ss:$0 sm:$0xff] }
 0x133   : > { %v472_v54 = vrot.slane %v454_v50, 1  ;;  %v463_v56 = vshll.u32 %v454_v50, 16 }
 0x134   : > { %v453_v52 = vsel %vm452_vm7, 0, %v447_v49 }
 0x135   : > { %v471_v53 = vrot.slane %v453_v52, 1  ;;  %v458_v55 = vshll.u32 %v453_v52, 16  ;;  %v456_v59 = vshrl.u32 %v453_v52, 16  ;;  %v465_v62 = vrot.slane %v463_v56, 1 }
 0x137   : > { %v473_v58 = vsel %vm351_vm1, %v471_v53, %v472_v54  ;;  %v460_v60 = vrot.slane %v458_v55, 1 }
 0x138   : > { %852 = vmatmul.msk.bf16.vlgmr.msra.gmra.mxu2 %vm360_vm3, %v473_v58 }
 0x139   : > { %v461_v61 = vor.u32 %v460_v60, %v456_v59 }
 0x13b   : > { %v466_v63 = vsel %vm336_vm0, %v461_v61, %v465_v62 }
 0x13c   : > { %467 = vrot.lane.b32.xlu1 %v466_v63, %s999_s18  ;;  %s948_s18 = sshra.s32 %s693_s22, 4  ;;  %s949_s18 = int_to_ptr.hbm [resolvable:$true] %s948_s18 }
 0x13d   : > { %s950_s23 = scalar_lea.hbm %s949_s18, 16  ;;  %p955_p0 = scmp.lt.s32.totalorder %s949_s18, %s1230_s8 }
 0x13e   : > { %p951_p11 = scmp.ne.s32.totalorder %s949_s18, %s950_s23  ;;  %p956_p1 = scmp.lt.s32.totalorder %s954_s26, %s950_s23 }
 0x140   : > { %p952_p12 = pnand %p951_p11, %p1086_p5  ;;  %p957_p2 = por %p956_p1, %p955_p0 }
 0x142   : > { %p953_p13 = pneg %p952_p12 }
 0x144   : > { %p958_p3 = pnand %p957_p2, %p953_p13 }
 0x1ae   : > { %v468_v0 = vpop.permute.xlu1 %467 }
 0x1af   : > { %v475_v1 = vsel %vm360_vm3, %v453_v52, %v468_v0 }
 0x1b0   : > { %588 = vmatmul.bf16.vlgmr.msra.gmra.mxu1 %v475_v1 }
 0x1bb   : > { %v603_v3 = vpop.f32.mrf.mxu2 }
 0x1c3   : > { %v605_v12 = vpop.f32.mrf.mxu2 }
 0x22d   : > { %v589_v4 = vpop.f32.mrf.mxu1 }
 0x22e   : > { %v590_v5 = vadd.f32 %v925_v2, %v589_v4 }
 0x230   : > { %v604_v7 = vadd.f32 %v603_v3, %v590_v5 }
 0x232   : > { %v610_v8 = vadd.f32 %v608_v6, %v604_v7 }
 0x234   : > { %v612_v9 = vsel %vm357_vm2, %v610_v8, 0.0 }
 0x235   : > { %v591_v10 = vpop.f32.mrf.mxu1  ;;  %613 = vadd.xlane.f32.xlu1 %v612_v9 }
 0x236   : > { %v592_v11 = vadd.f32 %v925_v2, %v591_v10 }
 0x238   : > { %v606_v14 = vadd.f32 %v605_v12, %v592_v11 }
 0x23a   : > { %v611_v15 = vadd.f32 %v609_v13, %v606_v14 }
 0x23c   : > { %v615_v16 = vsel %vm357_vm2, %v611_v15, 0.0 }
 0x23d   : > { %616 = vadd.xlane.f32.xlu2 %v615_v16 }
 0x2a8   : > { %v614_v24 = vpop.xlane.xlu1 %613 }
 0x2a9   : > { %v625_v25 = vmul.f32 %v624_v23, %v614_v24 }
 0x2ab   : > { %v627_v26 = vsub.f32 %v610_v8, %v625_v25 }
 0x2ad   : > { %v629_v27 = vmul.f32 %v627_v26, %v627_v26 }
 0x2af   : > { %v631_v28 = vsel %vm357_vm2, %v629_v27, 0.0 }
 0x2b0   : > { %v617_v29 = vpop.xlane.xlu2 %616  ;;  %632 = vadd.xlane.f32.xlu2 %v631_v28 }
 0x2b1   : > { %v626_v30 = vmul.f32 %v624_v23, %v617_v29 }
 0x2b3   : > { %v628_v31 = vsub.f32 %v611_v15, %v626_v30 }
 0x2b5   : > { %v630_v32 = vmul.f32 %v628_v31, %v628_v31 }
 0x2b7   : > { %v634_v33 = vsel %vm357_vm2, %v630_v32, 0.0 }
 0x2b8   : > { %635 = vadd.xlane.f32.xlu0 %v634_v33 }
 0x323   : > { %v633_v34 = vpop.xlane.xlu2 %632 }
 0x324   : > { %v637_v35 = vmul.f32 %v633_v34, %v624_v23 }
 0x326   : > { %v639_v36 = vadd.f32 1e-05, %v637_v35 }
 0x328   : > { %930 = vrsqrt.f32 %v639_v36  ;;  %vm647_vm10 = vweird.f32 %v639_v36 }
 0x32b   : > { %v636_v37 = vpop.xlane.xlu0 %635 }
 0x32c   : > { %v638_v38 = vmul.f32 %v636_v37, %v624_v23 }
 0x32e   : > { %v931_v39 = vpop.eup %930  ;;  %v640_v40 = vadd.f32 1e-05, %v638_v38 }
 0x32f   : > { %v642_v41 = vmul.f32 %v931_v39, %v639_v36  ;;  %vm648_vm9 = vweird.f32 %v931_v39 }
 0x330   : > { %932 = vrsqrt.f32 %v640_v40  ;;  %vm649_vm11 = vmor %vm647_vm10, %vm648_vm9  ;;  %vm657_vm13 = vweird.f32 %v640_v40 }
 0x331   : > { %v643_v42 = vmul.f32 %v931_v39, %v642_v41 }
 0x333   : > { %v644_v43 = vmul.f32 0.5, %v643_v42 }
 0x335   : > { %v645_v44 = vsub.f32 1.5, %v644_v43 }
 0x336   : > { %v933_v45 = vpop.eup %932 }
 0x337   : > { %v646_v46 = vmul.f32 %v931_v39, %v645_v44  ;;  %v652_v47 = vmul.f32 %v933_v45, %v640_v40  ;;  %vm658_vm12 = vweird.f32 %v933_v45 }
 0x338   : > { %vm659_vm14 = vmor %vm657_vm13, %vm658_vm12 }
 0x339   : > { %v650_v49 = vsel %vm649_vm11, %v931_v39, %v646_v46  ;;  %v653_v50 = vmul.f32 %v933_v45, %v652_v47 }
 0x33a   : > { %v661_v52 = vmul.f32 %v650_v49, %v627_v26 }
 0x33b   : > { %v654_v53 = vmul.f32 0.5, %v653_v50 }
 0x33c   : > { %v667_v54 = vmul.f32 %v926_v48, %v661_v52 }
 0x33d   : > { %v655_v55 = vsub.f32 1.5, %v654_v53 }
 0x33e   : > { %v673_v56 = vadd.f32 %v927_v51, %v667_v54 }
 0x33f   : > { %v656_v57 = vmul.f32 %v933_v45, %v655_v55 }
 0x340   : > { %675 = vst.msk [vmem:[%s313_s20] sm:$0xff] %vm357_vm2, %v673_v56 }
 0x341   : > { %v660_v58 = vsel %vm659_vm14, %v933_v45, %v656_v57 }
 0x342   : > { %v662_v59 = vmul.f32 %v660_v58, %v628_v31 }
 0x344   : > { %v668_v60 = vmul.f32 %v926_v48, %v662_v59 }
 0x346   : > { %v674_v61 = vadd.f32 %v927_v51, %v668_v60 }
 0x348   : > { %676 = vst.msk [vmem:[%s313_s20 + $0x8] sm:$0xff] %vm357_vm2, %v674_v61 }
 0x349   : > { %961 = shalt.err (!%p958_p3)
}
 0x34a   : > { %s1001_s19 = smov 128   ;;  %s1002_s13 = smov 8  }
 0x34b   : > { %880 = dma.vmem_to_hbm [thread:$0]  (%p1086_p5), %s691_s21, 256, %s693_s22, %s678_s9, %s1001_s19, %s1001_s19, %s1002_s13  }
 0x34c PF: > { %p886_p4 = scmp.ge.s32.totalorder %s996_s30, 2  ;;  %s707_s17 = sand.u32 1, %s984_s27  }
 0x34d   : > { %s708_s20 = scalar_lea.sflag [#allocation3], %s707_s17 }
 0x34e   : > { %p883_p7 = pnand %p886_p4, %p1090_p6 }
 0x350   : > { %p884_p8 = pneg %p883_p7 }
 0x352   : > { %979 = dma.done.wait (%p884_p8), %s708_s20, 256  }
 0x353   : > { %981 = vsyncadd (%p884_p8), %s708_s20, 4294967040  ;;  %p18_p9 = scmp.ge.s32.totalorder %s1073_s11, 4   ;;  %s1233_s27 = smov %s988_s28 }
 0x354   : > { %s1234_s28 = smov %s992_s29  ;;  %s1235_s29 = smov %s1084_s14 }
 0x355   : > { %s1236_s30 = smov %s1073_s11  ;;  %20 = sbr.rel (!%p18_p9) target bundleno = 3 (0x3), region = 90 }
 0x35a   :  { %714 = vsyncpa [#allocation3], 1 }
 0x35b   :  { %716 = vsyncpa [#allocation3 + $0x1], 1 }

</bundles_post_ra>
